<compile_context>
chip_gen: v6e
topology: v6e:2x2x1
jax: 0.10.0
libtpu: 0.0.40
codegen_flags: <defaults>
</compile_context>

<pallas_src>
import functools

import jax
import jax.numpy as jnp
from jax.experimental import pallas as pl
from jax.experimental.pallas import tpu as pltpu


def tinysnn_kernel(x_ref, w1_ref, b1_ref, w2_ref, b2_ref, w3_ref, b3_ref,
                   out_ref, *, T, tau, v_th):
    inv_tau = 1.0 / tau

    # Loop-invariant loads, done once (weights already bf16).
    x = x_ref[...]                    # (M, D0) f32 analog input, same every step
    w1 = w1_ref[...]
    w2 = w2_ref[...]
    w3 = w3_ref[...]

    M, D0 = x_ref.shape
    D1 = w1_ref.shape[1]
    D2 = w2_ref.shape[1]
    D3 = w3_ref.shape[1]

    # Hoisted bias broadcasts: 3 broadcast_in_dim total, not 3*T.
    b1 = jnp.broadcast_to(b1_ref[...], (T * M, D1))
    b2 = jnp.broadcast_to(b2_ref[...], (M, D2))
    b3 = jnp.broadcast_to(b3_ref[...], (T * M, D3))

    def lif_step(v, inp):
        # v <- v + (inp - v)/tau ; spike = H(v - v_th) ; hard reset to 0 on spike
        v_new = v + (inp - v) * inv_tau
        spike = v_new >= v_th
        v_next = jnp.where(spike, 0.0, v_new)
        # Spikes are exactly 0/1 -> bf16 cast is lossless; feeds the MXU natively.
        return v_next, spike.astype(jnp.bfloat16)

    # --- Stage 1: to_spikes recurrence depends only on the constant x, so
    # precompute the full spike train and batch linear1 into ONE (T*M)-row matmul.
    v0 = jnp.zeros((M, D0), jnp.float32)
    s0_steps = []
    for _ in range(T):                                   # static T, fully unrolled
        v0, s0 = lif_step(v0, x)
        s0_steps.append(s0)
    s0_all = jnp.concatenate(s0_steps, axis=0)           # (T*M, D0) bf16
    h1_all = jnp.dot(s0_all, w1, preferred_element_type=jnp.float32) + b1

    # --- Stage 2: sequential recurrence spike1 -> linear2 -> spike2.
    # Only the layer-2 dot sits on the per-step critical path now.
    v1 = jnp.zeros((M, D1), jnp.float32)
    v2 = jnp.zeros((M, D2), jnp.float32)
    s2_steps = []
    for t in range(T):                                   # static T, fully unrolled
        v1, s1 = lif_step(v1, h1_all[t * M:(t + 1) * M, :])        # spike1
        h2 = jnp.dot(s1, w2, preferred_element_type=jnp.float32) + b2  # linear2
        v2, s2 = lif_step(v2, h2)                                   # spike2
        s2_steps.append(s2)
    s2_all = jnp.concatenate(s2_steps, axis=0)           # (T*M, D2) bf16

    # --- Stage 3: one batched matmul for linear3 + one store of all T slices.
    out_all = jnp.dot(s2_all, w3, preferred_element_type=jnp.float32) + b3
    out_ref[...] = out_all.reshape(T, M, D3)


def tinysnn_forward(x, params, *, T, tau=2.0, v_th=1.0):
    """x: (B, S, D0) float32 -> (T, B, S, D3) float32."""
    B, S, D0 = x.shape
    M = B * S
    w1, b1, w2, b2, w3, b3 = params
    D1 = w1.shape[1]
    D2 = w2.shape[1]
    D3 = w3.shape[1]
    x2 = x.reshape(M, D0).astype(jnp.float32)

    # bf16 weights: halves weight DMA/VMEM; spikes are cast to bf16 in-kernel.
    w1b = w1.astype(jnp.bfloat16)
    w2b = w2.astype(jnp.bfloat16)
    w3b = w3.astype(jnp.bfloat16)

    kernel = functools.partial(tinysnn_kernel, T=T, tau=tau, v_th=v_th)
    vmem = pl.BlockSpec(memory_space=pltpu.MemorySpace.VMEM)

    # Advisory cost hint so XLA can overlap this microseconds-scale custom call.
    flops = 2 * T * M * (D0 * D1 + D1 * D2 + D2 * D3)
    bytes_accessed = 4 * (M * D0 + T * M * D3 + D1 + D2 + D3) \
        + 2 * (D0 * D1 + D1 * D2 + D2 * D3)
    cost = pl.CostEstimate(flops=flops, transcendentals=0,
                           bytes_accessed=bytes_accessed)

    # Single grid-less invocation: everything VMEM-resident, one output DMA.
    # Explicit VMEM budget (stays under the 32 MiB scoped default on all gens,
    # including v7x's 64 MiB physical VMEM). At production M = B*S (hundreds+ of
    # rows) switch to a tiled/parallel M grid:
    #   grid=(M//tm,), BlockSpecs tiling x/out over M, weights untiled,
    #   dimension_semantics=("parallel",)  -> double-buffered DMA + v7x megacore.
    out = pl.pallas_call(
        kernel,
        out_shape=jax.ShapeDtypeStruct((T, M, D3), jnp.float32),
        in_specs=[vmem] * 7,
        out_specs=vmem,
        cost_estimate=cost,
        compiler_params=pltpu.CompilerParams(vmem_limit_bytes=32 * 1024 * 1024),
    )(x2, w1b, b1, w2b, b2, w3b, b3)
    return out.reshape(T, B, S, D3)


def init_params(key, hidden_sizes):
    """nn.Linear-style params; stored as (in, out) so the kernel does x @ W + b."""
    d0, d1, d2, d3 = hidden_sizes
    ks = jax.random.split(key, 6)

    def linear(kw, kb, din, dout):
        bound = 1.0 / jnp.sqrt(din)
        w = jax.random.uniform(kw, (din, dout), jnp.float32, -bound, bound)
        b = jax.random.uniform(kb, (1, dout), jnp.float32, -bound, bound)
        return w, b

    w1, b1 = linear(ks[0], ks[1], d0, d1)
    w2, b2 = linear(ks[2], ks[3], d1, d2)
    w3, b3 = linear(ks[4], ks[5], d2, d3)
    return (w1, b1, w2, b2, w3, b3)


if __name__ == "__main__":
    # Small shapes consistent with forward(): x is (B, lenSeq, dimSample)
    B, S = 2, 8
    hidden_sizes = (32, 64, 64, 16)   # hidden_sizes[0..3]
    T = 4                             # args.T

    key = jax.random.PRNGKey(0)
    kx, kp = jax.random.split(key)
    x = jax.random.normal(kx, (B, S, hidden_sizes[0]), jnp.float32)
    params = init_params(kp, hidden_sizes)

    out = tinysnn_forward(x, params, T=T)
    out = jax.block_until_ready(out)
    assert out.shape == (T, B, S, hidden_sizes[3]), out.shape
    assert out.dtype == jnp.float32
    print("KERNEL_OK")
</pallas_src>

<mosaic_0001>
module attributes {stable_mosaic.version = 11 : i64} {
  func.func @tinysnn_kernel(%arg0: memref<16x32xf32, #tpu.memory_space<vmem>>, %arg1: memref<32x64xbf16, #tpu.memory_space<vmem>>, %arg2: memref<1x64xf32, #tpu.memory_space<vmem>>, %arg3: memref<64x64xbf16, #tpu.memory_space<vmem>>, %arg4: memref<1x64xf32, #tpu.memory_space<vmem>>, %arg5: memref<64x16xbf16, #tpu.memory_space<vmem>>, %arg6: memref<1x16xf32, #tpu.memory_space<vmem>>, %arg7: memref<4x16x16xf32, #tpu.memory_space<vmem>>) attributes {dimension_semantics = [], scalar_prefetch = 0 : i64, scratch_operands = 0 : i64, tpu.core_type = #tpu.core_type<tc>} {
    %c0 = arith.constant 0 : index
    %c0_0 = arith.constant 0 : index
    %0 = vector.load %arg0[%c0, %c0_0] : memref<16x32xf32, #tpu.memory_space<vmem>>, vector<16x32xf32>
    %c0_1 = arith.constant 0 : index
    %c0_2 = arith.constant 0 : index
    %1 = vector.load %arg1[%c0_1, %c0_2] : memref<32x64xbf16, #tpu.memory_space<vmem>>, vector<32x64xbf16>
    %c0_3 = arith.constant 0 : index
    %c0_4 = arith.constant 0 : index
    %2 = vector.load %arg3[%c0_3, %c0_4] : memref<64x64xbf16, #tpu.memory_space<vmem>>, vector<64x64xbf16>
    %c0_5 = arith.constant 0 : index
    %c0_6 = arith.constant 0 : index
    %3 = vector.load %arg5[%c0_5, %c0_6] : memref<64x16xbf16, #tpu.memory_space<vmem>>, vector<64x16xbf16>
    %c0_7 = arith.constant 0 : index
    %c0_8 = arith.constant 0 : index
    %4 = vector.load %arg2[%c0_7, %c0_8] : memref<1x64xf32, #tpu.memory_space<vmem>>, vector<1x64xf32>
    %5 = vector.shape_cast %4 : vector<1x64xf32> to vector<1x64xf32>
    %6 = vector.broadcast %5 : vector<1x64xf32> to vector<64x64xf32>
    %c0_9 = arith.constant 0 : index
    %c0_10 = arith.constant 0 : index
    %7 = vector.load %arg4[%c0_9, %c0_10] : memref<1x64xf32, #tpu.memory_space<vmem>>, vector<1x64xf32>
    %8 = vector.shape_cast %7 : vector<1x64xf32> to vector<1x64xf32>
    %9 = vector.broadcast %8 : vector<1x64xf32> to vector<16x64xf32>
    %c0_11 = arith.constant 0 : index
    %c0_12 = arith.constant 0 : index
    %10 = vector.load %arg6[%c0_11, %c0_12] : memref<1x16xf32, #tpu.memory_space<vmem>>, vector<1x16xf32>
    %11 = vector.shape_cast %10 : vector<1x16xf32> to vector<1x16xf32>
    %12 = vector.broadcast %11 : vector<1x16xf32> to vector<64x16xf32>
    %cst = arith.constant 0.000000e+00 : f32
    %13 = vector.broadcast %cst : f32 to vector<16x32xf32>
    %14 = arith.subf %0, %13 : vector<16x32xf32>
    %cst_13 = arith.constant 5.000000e-01 : f32
    %15 = vector.broadcast %cst_13 : f32 to vector<16x32xf32>
    %16 = arith.mulf %14, %15 : vector<16x32xf32>
    %17 = arith.addf %13, %16 : vector<16x32xf32>
    %cst_14 = arith.constant 1.000000e+00 : f32
    %18 = vector.broadcast %cst_14 : f32 to vector<16x32xf32>
    %19 = arith.cmpf oge, %17, %18 : vector<16x32xf32>
    %cst_15 = arith.constant 0.000000e+00 : f32
    %20 = vector.broadcast %cst_15 : f32 to vector<16x32xf32>
    %21 = arith.select %19, %20, %17 : vector<16x32xi1>, vector<16x32xf32>
    %22 = arith.extui %19 : vector<16x32xi1> to vector<16x32xi32>
    %23 = arith.sitofp %22 : vector<16x32xi32> to vector<16x32xf32>
    %24 = arith.truncf %23 : vector<16x32xf32> to vector<16x32xbf16>
    %25 = arith.subf %0, %21 : vector<16x32xf32>
    %cst_16 = arith.constant 5.000000e-01 : f32
    %26 = vector.broadcast %cst_16 : f32 to vector<16x32xf32>
    %27 = arith.mulf %25, %26 : vector<16x32xf32>
    %28 = arith.addf %21, %27 : vector<16x32xf32>
    %cst_17 = arith.constant 1.000000e+00 : f32
    %29 = vector.broadcast %cst_17 : f32 to vector<16x32xf32>
    %30 = arith.cmpf oge, %28, %29 : vector<16x32xf32>
    %cst_18 = arith.constant 0.000000e+00 : f32
    %31 = vector.broadcast %cst_18 : f32 to vector<16x32xf32>
    %32 = arith.select %30, %31, %28 : vector<16x32xi1>, vector<16x32xf32>
    %33 = arith.extui %30 : vector<16x32xi1> to vector<16x32xi32>
    %34 = arith.sitofp %33 : vector<16x32xi32> to vector<16x32xf32>
    %35 = arith.truncf %34 : vector<16x32xf32> to vector<16x32xbf16>
    %36 = arith.subf %0, %32 : vector<16x32xf32>
    %cst_19 = arith.constant 5.000000e-01 : f32
    %37 = vector.broadcast %cst_19 : f32 to vector<16x32xf32>
    %38 = arith.mulf %36, %37 : vector<16x32xf32>
    %39 = arith.addf %32, %38 : vector<16x32xf32>
    %cst_20 = arith.constant 1.000000e+00 : f32
    %40 = vector.broadcast %cst_20 : f32 to vector<16x32xf32>
    %41 = arith.cmpf oge, %39, %40 : vector<16x32xf32>
    %cst_21 = arith.constant 0.000000e+00 : f32
    %42 = vector.broadcast %cst_21 : f32 to vector<16x32xf32>
    %43 = arith.select %41, %42, %39 : vector<16x32xi1>, vector<16x32xf32>
    %44 = arith.extui %41 : vector<16x32xi1> to vector<16x32xi32>
    %45 = arith.sitofp %44 : vector<16x32xi32> to vector<16x32xf32>
    %46 = arith.truncf %45 : vector<16x32xf32> to vector<16x32xbf16>
    %47 = arith.subf %0, %43 : vector<16x32xf32>
    %cst_22 = arith.constant 5.000000e-01 : f32
    %48 = vector.broadcast %cst_22 : f32 to vector<16x32xf32>
    %49 = arith.mulf %47, %48 : vector<16x32xf32>
    %50 = arith.addf %43, %49 : vector<16x32xf32>
    %cst_23 = arith.constant 1.000000e+00 : f32
    %51 = vector.broadcast %cst_23 : f32 to vector<16x32xf32>
    %52 = arith.cmpf oge, %50, %51 : vector<16x32xf32>
    %53 = arith.extui %52 : vector<16x32xi1> to vector<16x32xi32>
    %54 = arith.sitofp %53 : vector<16x32xi32> to vector<16x32xf32>
    %55 = arith.truncf %54 : vector<16x32xf32> to vector<16x32xbf16>
    %56 = tpu.concatenate %24, %35, %46, %55 in 0 : vector<16x32xbf16>, vector<16x32xbf16>, vector<16x32xbf16>, vector<16x32xbf16> -> vector<64x32xbf16>
    %cst_24 = arith.constant dense<0.000000e+00> : vector<64x64xf32>
    %57 = tpu.matmul %56, %1, %cst_24 {dimension_numbers = #tpu.dot_dimension_numbers<[1], [0], [0], [1], [0, 0, 1, 1], [], []>} : vector<64x32xbf16>, vector<32x64xbf16>, vector<64x64xf32> -> vector<64x64xf32>
    %58 = arith.addf %57, %6 : vector<64x64xf32>
    %cst_25 = arith.constant 0.000000e+00 : f32
    %59 = vector.broadcast %cst_25 : f32 to vector<16x64xf32>
    %cst_26 = arith.constant 0.000000e+00 : f32
    %60 = vector.broadcast %cst_26 : f32 to vector<16x64xf32>
    %61 = vector.extract_strided_slice %58 {offsets = [0, 0], sizes = [16, 64], strides = [1, 1]} : vector<64x64xf32> to vector<16x64xf32>
    %62 = arith.subf %61, %59 : vector<16x64xf32>
    %cst_27 = arith.constant 5.000000e-01 : f32
    %63 = vector.broadcast %cst_27 : f32 to vector<16x64xf32>
    %64 = arith.mulf %62, %63 : vector<16x64xf32>
    %65 = arith.addf %59, %64 : vector<16x64xf32>
    %cst_28 = arith.constant 1.000000e+00 : f32
    %66 = vector.broadcast %cst_28 : f32 to vector<16x64xf32>
    %67 = arith.cmpf oge, %65, %66 : vector<16x64xf32>
    %cst_29 = arith.constant 0.000000e+00 : f32
    %68 = vector.broadcast %cst_29 : f32 to vector<16x64xf32>
    %69 = arith.select %67, %68, %65 : vector<16x64xi1>, vector<16x64xf32>
    %70 = arith.extui %67 : vector<16x64xi1> to vector<16x64xi32>
    %71 = arith.sitofp %70 : vector<16x64xi32> to vector<16x64xf32>
    %72 = arith.truncf %71 : vector<16x64xf32> to vector<16x64xbf16>
    %cst_30 = arith.constant dense<0.000000e+00> : vector<16x64xf32>
    %73 = tpu.matmul %72, %2, %cst_30 {dimension_numbers = #tpu.dot_dimension_numbers<[1], [0], [0], [1], [0, 0, 1, 1], [], []>} : vector<16x64xbf16>, vector<64x64xbf16>, vector<16x64xf32> -> vector<16x64xf32>
    %74 = arith.addf %73, %9 : vector<16x64xf32>
    %75 = arith.subf %74, %60 : vector<16x64xf32>
    %cst_31 = arith.constant 5.000000e-01 : f32
    %76 = vector.broadcast %cst_31 : f32 to vector<16x64xf32>
    %77 = arith.mulf %75, %76 : vector<16x64xf32>
    %78 = arith.addf %60, %77 : vector<16x64xf32>
    %cst_32 = arith.constant 1.000000e+00 : f32
    %79 = vector.broadcast %cst_32 : f32 to vector<16x64xf32>
    %80 = arith.cmpf oge, %78, %79 : vector<16x64xf32>
    %cst_33 = arith.constant 0.000000e+00 : f32
    %81 = vector.broadcast %cst_33 : f32 to vector<16x64xf32>
    %82 = arith.select %80, %81, %78 : vector<16x64xi1>, vector<16x64xf32>
    %83 = arith.extui %80 : vector<16x64xi1> to vector<16x64xi32>
    %84 = arith.sitofp %83 : vector<16x64xi32> to vector<16x64xf32>
    %85 = arith.truncf %84 : vector<16x64xf32> to vector<16x64xbf16>
    %86 = vector.extract_strided_slice %58 {offsets = [16, 0], sizes = [16, 64], strides = [1, 1]} : vector<64x64xf32> to vector<16x64xf32>
    %87 = arith.subf %86, %69 : vector<16x64xf32>
    %cst_34 = arith.constant 5.000000e-01 : f32
    %88 = vector.broadcast %cst_34 : f32 to vector<16x64xf32>
    %89 = arith.mulf %87, %88 : vector<16x64xf32>
    %90 = arith.addf %69, %89 : vector<16x64xf32>
    %cst_35 = arith.constant 1.000000e+00 : f32
    %91 = vector.broadcast %cst_35 : f32 to vector<16x64xf32>
    %92 = arith.cmpf oge, %90, %91 : vector<16x64xf32>
    %cst_36 = arith.constant 0.000000e+00 : f32
    %93 = vector.broadcast %cst_36 : f32 to vector<16x64xf32>
    %94 = arith.select %92, %93, %90 : vector<16x64xi1>, vector<16x64xf32>
    %95 = arith.extui %92 : vector<16x64xi1> to vector<16x64xi32>
    %96 = arith.sitofp %95 : vector<16x64xi32> to vector<16x64xf32>
    %97 = arith.truncf %96 : vector<16x64xf32> to vector<16x64xbf16>
    %cst_37 = arith.constant dense<0.000000e+00> : vector<16x64xf32>
    %98 = tpu.matmul %97, %2, %cst_37 {dimension_numbers = #tpu.dot_dimension_numbers<[1], [0], [0], [1], [0, 0, 1, 1], [], []>} : vector<16x64xbf16>, vector<64x64xbf16>, vector<16x64xf32> -> vector<16x64xf32>
    %99 = arith.addf %98, %9 : vector<16x64xf32>
    %100 = arith.subf %99, %82 : vector<16x64xf32>
    %cst_38 = arith.constant 5.000000e-01 : f32
    %101 = vector.broadcast %cst_38 : f32 to vector<16x64xf32>
    %102 = arith.mulf %100, %101 : vector<16x64xf32>
    %103 = arith.addf %82, %102 : vector<16x64xf32>
    %cst_39 = arith.constant 1.000000e+00 : f32
    %104 = vector.broadcast %cst_39 : f32 to vector<16x64xf32>
    %105 = arith.cmpf oge, %103, %104 : vector<16x64xf32>
    %cst_40 = arith.constant 0.000000e+00 : f32
    %106 = vector.broadcast %cst_40 : f32 to vector<16x64xf32>
    %107 = arith.select %105, %106, %103 : vector<16x64xi1>, vector<16x64xf32>
    %108 = arith.extui %105 : vector<16x64xi1> to vector<16x64xi32>
    %109 = arith.sitofp %108 : vector<16x64xi32> to vector<16x64xf32>
    %110 = arith.truncf %109 : vector<16x64xf32> to vector<16x64xbf16>
    %111 = vector.extract_strided_slice %58 {offsets = [32, 0], sizes = [16, 64], strides = [1, 1]} : vector<64x64xf32> to vector<16x64xf32>
    %112 = arith.subf %111, %94 : vector<16x64xf32>
    %cst_41 = arith.constant 5.000000e-01 : f32
    %113 = vector.broadcast %cst_41 : f32 to vector<16x64xf32>
    %114 = arith.mulf %112, %113 : vector<16x64xf32>
    %115 = arith.addf %94, %114 : vector<16x64xf32>
    %cst_42 = arith.constant 1.000000e+00 : f32
    %116 = vector.broadcast %cst_42 : f32 to vector<16x64xf32>
    %117 = arith.cmpf oge, %115, %116 : vector<16x64xf32>
    %cst_43 = arith.constant 0.000000e+00 : f32
    %118 = vector.broadcast %cst_43 : f32 to vector<16x64xf32>
    %119 = arith.select %117, %118, %115 : vector<16x64xi1>, vector<16x64xf32>
    %120 = arith.extui %117 : vector<16x64xi1> to vector<16x64xi32>
    %121 = arith.sitofp %120 : vector<16x64xi32> to vector<16x64xf32>
    %122 = arith.truncf %121 : vector<16x64xf32> to vector<16x64xbf16>
    %cst_44 = arith.constant dense<0.000000e+00> : vector<16x64xf32>
    %123 = tpu.matmul %122, %2, %cst_44 {dimension_numbers = #tpu.dot_dimension_numbers<[1], [0], [0], [1], [0, 0, 1, 1], [], []>} : vector<16x64xbf16>, vector<64x64xbf16>, vector<16x64xf32> -> vector<16x64xf32>
    %124 = arith.addf %123, %9 : vector<16x64xf32>
    %125 = arith.subf %124, %107 : vector<16x64xf32>
    %cst_45 = arith.constant 5.000000e-01 : f32
    %126 = vector.broadcast %cst_45 : f32 to vector<16x64xf32>
    %127 = arith.mulf %125, %126 : vector<16x64xf32>
    %128 = arith.addf %107, %127 : vector<16x64xf32>
    %cst_46 = arith.constant 1.000000e+00 : f32
    %129 = vector.broadcast %cst_46 : f32 to vector<16x64xf32>
    %130 = arith.cmpf oge, %128, %129 : vector<16x64xf32>
    %cst_47 = arith.constant 0.000000e+00 : f32
    %131 = vector.broadcast %cst_47 : f32 to vector<16x64xf32>
    %132 = arith.select %130, %131, %128 : vector<16x64xi1>, vector<16x64xf32>
    %133 = arith.extui %130 : vector<16x64xi1> to vector<16x64xi32>
    %134 = arith.sitofp %133 : vector<16x64xi32> to vector<16x64xf32>
    %135 = arith.truncf %134 : vector<16x64xf32> to vector<16x64xbf16>
    %136 = vector.extract_strided_slice %58 {offsets = [48, 0], sizes = [16, 64], strides = [1, 1]} : vector<64x64xf32> to vector<16x64xf32>
    %137 = arith.subf %136, %119 : vector<16x64xf32>
    %cst_48 = arith.constant 5.000000e-01 : f32
    %138 = vector.broadcast %cst_48 : f32 to vector<16x64xf32>
    %139 = arith.mulf %137, %138 : vector<16x64xf32>
    %140 = arith.addf %119, %139 : vector<16x64xf32>
    %cst_49 = arith.constant 1.000000e+00 : f32
    %141 = vector.broadcast %cst_49 : f32 to vector<16x64xf32>
    %142 = arith.cmpf oge, %140, %141 : vector<16x64xf32>
    %143 = arith.extui %142 : vector<16x64xi1> to vector<16x64xi32>
    %144 = arith.sitofp %143 : vector<16x64xi32> to vector<16x64xf32>
    %145 = arith.truncf %144 : vector<16x64xf32> to vector<16x64xbf16>
    %cst_50 = arith.constant dense<0.000000e+00> : vector<16x64xf32>
    %146 = tpu.matmul %145, %2, %cst_50 {dimension_numbers = #tpu.dot_dimension_numbers<[1], [0], [0], [1], [0, 0, 1, 1], [], []>} : vector<16x64xbf16>, vector<64x64xbf16>, vector<16x64xf32> -> vector<16x64xf32>
    %147 = arith.addf %146, %9 : vector<16x64xf32>
    %148 = arith.subf %147, %132 : vector<16x64xf32>
    %cst_51 = arith.constant 5.000000e-01 : f32
    %149 = vector.broadcast %cst_51 : f32 to vector<16x64xf32>
    %150 = arith.mulf %148, %149 : vector<16x64xf32>
    %151 = arith.addf %132, %150 : vector<16x64xf32>
    %cst_52 = arith.constant 1.000000e+00 : f32
    %152 = vector.broadcast %cst_52 : f32 to vector<16x64xf32>
    %153 = arith.cmpf oge, %151, %152 : vector<16x64xf32>
    %154 = arith.extui %153 : vector<16x64xi1> to vector<16x64xi32>
    %155 = arith.sitofp %154 : vector<16x64xi32> to vector<16x64xf32>
    %156 = arith.truncf %155 : vector<16x64xf32> to vector<16x64xbf16>
    %157 = tpu.concatenate %85, %110, %135, %156 in 0 : vector<16x64xbf16>, vector<16x64xbf16>, vector<16x64xbf16>, vector<16x64xbf16> -> vector<64x64xbf16>
    %cst_53 = arith.constant dense<0.000000e+00> : vector<64x16xf32>
    %158 = tpu.matmul %157, %3, %cst_53 {dimension_numbers = #tpu.dot_dimension_numbers<[1], [0], [0], [1], [0, 0, 1, 1], [], []>} : vector<64x64xbf16>, vector<64x16xbf16>, vector<64x16xf32> -> vector<64x16xf32>
    %159 = arith.addf %158, %12 : vector<64x16xf32>
    %160 = vector.shape_cast %159 : vector<64x16xf32> to vector<4x16x16xf32>
    %c0_54 = arith.constant 0 : index
    %c0_55 = arith.constant 0 : index
    %c0_56 = arith.constant 0 : index
    %161 = vector.load %arg7[%c0_54, %c0_55, %c0_56] : memref<4x16x16xf32, #tpu.memory_space<vmem>>, vector<4x16x16xf32>
    tpu.vector_store %arg7[%c0_54, %c0_55, %c0_56], %160 {strides = array<i32>} : memref<4x16x16xf32, #tpu.memory_space<vmem>>, vector<4x16x16xf32>,
    return
  }
}

</mosaic_0001>

<bundles_post_ra>
// kernel: tpu_custom_call.1
= control target key start
LH: loop header
LB: loop body
LE: loop exit
PB: predicated region body
PF: predicated region fallthrough
CT: control target
= control target key end

     0   :  { %12 = vsyncpa [#allocation3], 0  ;;  %s1129_s0 = inlined_call_operand.hbm [shape: f32[16,32], index: 0, kind: input, shape index: {}]   ;;  %s1130_s1 = inlined_call_operand.hbm [shape: bf16[32,64], index: 1, kind: input, shape index: {}]   ;;  %s1131_s2 = inlined_call_operand.vmem [shape: f32[1,64], index: 2, kind: input, shape index: {}]   ;;  %s1132_s3 = inlined_call_operand.vmem [shape: bf16[64,64], index: 3, kind: input, shape index: {}]   ;;  %s1133_s4 = inlined_call_operand.vmem [shape: f32[1,64], index: 4, kind: input, shape index: {}]   ;;  %s1134_s5 = inlined_call_operand.vmem [shape: bf16[64,16], index: 5, kind: input, shape index: {}]   ;;  %s1135_s6 = inlined_call_operand.vmem [shape: f32[1,16], index: 6, kind: input, shape index: {}]   ;;  %s1136_s7 = inlined_call_operand.hbm [shape: f32[4,16,16], index: 7, kind: output, shape index: {}]  }
   0x1   :  { %13 = vsyncpa [#allocation6], 0 }
   0x2   :  { %14 = vsyncpa [#allocation4], 0  ;;  %s930_s24 = smov [#allocation2]  }
   0x3   :  { %s20_s25 = sshll.u32 %s930_s24, 4  ;;  %s21_s25 = int_to_ptr.vmem [resolvable:$true] %s20_s25 }
   0x4   :  { %s872_s26 = scalar_lea.vmem %s21_s25, 256  ;;  %p877_p1 = scmp.lt.s32.totalorder %s21_s25, %s21_s25 }
   0x5   :  { %p873_p0 = scmp.ne.s32.totalorder %s21_s25, %s872_s26  ;;  %p878_p2 = scmp.lt.s32.totalorder %s872_s26, %s872_s26 }
   0x7   :  { %p879_p3 = por %p878_p2, %p877_p1 }
   0x9   :  { %p880_p4 = pnand %p879_p3, %p873_p0 }
   0xb   :  { %883 = shalt.err (!%p880_p4)
}
   0xc   :  { %s931_s27 = smov 128   ;;  %s932_s28 = smov 8  }
   0xd   :  { %26 = dma.hbm_to_vmem [thread:$0]  %s1129_s0, 256, %s21_s25, [#allocation3], %s931_s27, %s931_s27, %s932_s28  }
   0xe   :  { %s933_s8 = smov [#allocation5]  }
   0xf   :  { %s32_s9 = sshll.u32 %s933_s8, 4  ;;  %s33_s9 = int_to_ptr.vmem [resolvable:$true] %s32_s9 }
  0x10   :  { %s892_s10 = scalar_lea.vmem %s33_s9, 256  ;;  %p897_p6 = scmp.lt.s32.totalorder %s33_s9, %s33_s9 }
  0x11   :  { %p893_p5 = scmp.ne.s32.totalorder %s33_s9, %s892_s10  ;;  %p898_p7 = scmp.lt.s32.totalorder %s892_s10, %s892_s10 }
  0x13   :  { %p899_p8 = por %p898_p7, %p897_p6 }
  0x15   :  { %p900_p9 = pnand %p899_p8, %p893_p5 }
  0x17   :  { %903 = shalt.err (!%p900_p9)
}
  0x18   :  { %s934_s11 = smov 64   ;;  %s935_s12 = smov 4  }
  0x19   :  { %38 = dma.hbm_to_vmem [thread:$0]  %s1130_s1, 256, %s33_s9, [#allocation6], %s934_s11, %s934_s11, %s935_s12  }
  0x1a   :  { %924 = dma.done.wait [#allocation3], 256  }
  0x1b   :  { %925 = vsyncadd [#allocation3], 4294967040 }
  0x1c   :  { %926 = dma.done.wait [#allocation6], 256  }
  0x1d   :  { %927 = vsyncadd [#allocation6], 4294967040  ;;  %v936_v0 = vmov 0.0   ;;  %v854_v1 = vld [vmem:[#allocation5 + $0x8] sm:$0xff]   ;;  %v855_v2 = vld [vmem:[#allocation5] sm:$0xff]   ;;  %vm167_vm0 = vcmask 261120  }
  0x1e   :  { %781 = vmatprep.subr.bf16.mxu1 %v936_v0  ;;  %769 = vmatprep.subr.bf16.mxu0 %v854_v1  ;;  %v56_v3 = vld [vmem:[#allocation2] sm:$0xff]  ;;  %v57_v4 = vld [vmem:[#allocation2 + $0x8] sm:$0xff]  ;;  %v1005_v43 = vld [vmem:[%s1132_s3 + $0x18] sm:$0xff]   ;;  %vm937_vm9 = vmmov 0   ;;  %vm282_vm12 = vcmask 523264  }
  0x1f   :  { %770 = vmatpush3.bf16.msra.mxu0 %v854_v1  ;;  %v99_v5 = vmul.f32 0.5, %v56_v3  ;;  %v100_v6 = vmul.f32 0.5, %v57_v4  ;;  %782 = vmatpush3.bf16.msra.mxu1 %v1005_v43  ;;  %v1014_v44 = vld [vmem:[%s1132_s3 + $0x10] sm:$0xff]   ;;  %v1023_v45 = vld [vmem:[%s1132_s3 + $0x8] sm:$0xff]   ;;  %v1032_v46 = vld [vmem:[%s1132_s3] sm:$0xff]  }
  0x20   :  { %771 = vmatprep.subr.bf16.mxu0 %v855_v2  ;;  %783 = vmatprep.subr.bf16.mxu1 %v936_v0  ;;  %v1045_v48 = vld [vmem:[%s1131_s2] ss:$0 sm:$0xff] }
  0x21   :  { %vm103_vm1 = vcmp.ge.f32.partialorder %v99_v5, 1.0  ;;  %vm104_vm2 = vcmp.ge.f32.partialorder %v100_v6, 1.0  ;;  %789 = vmatprep.mubr.msk.bf16.mxu1 %vm937_vm9, %v936_v0 }
  0x22   :  { %v105_v7 = vsel %vm103_vm1, 0.0, %v99_v5  ;;  %v106_v8 = vsel %vm104_vm2, 0.0, %v100_v6  ;;  %v689_v9 = vsel %vm103_vm1, 1.0, %v936_v0  ;;  %v690_v10 = vsel %vm104_vm2, 1.0, %v936_v0 }
  0x23   :  { %772 = vmatpush3.bf16.msra.mxu0 %v855_v2  ;;  %v111_v11 = vpack.c.bf16 %v690_v10, %v689_v9  ;;  %v112_v12 = vsub.f32 %v56_v3, %v105_v7  ;;  %v113_v13 = vsub.f32 %v57_v4, %v106_v8  ;;  %784 = vmatpush3.bf16.msra.mxu1 %v1014_v44 }
  0x24   :  { %793 = vmatprep.subr.bf16.mxu0 %v936_v0  ;;  %785 = vmatprep.subr.bf16.mxu1 %v936_v0 }
  0x25   :  { %v114_v14 = vmul.f32 0.5, %v112_v12  ;;  %v115_v15 = vmul.f32 0.5, %v113_v13  ;;  %773 = vmatprep.mubr.msk.bf16.mxu0 %vm167_vm0, %v111_v11 }
  0x27   :  { %v116_v16 = vadd.f32 %v114_v14, %v105_v7  ;;  %v117_v17 = vadd.f32 %v115_v15, %v106_v8  ;;  %786 = vmatpush3.bf16.msra.mxu1 %v1023_v45 }
  0x28   :  { %787 = vmatprep.subr.bf16.mxu1 %v936_v0 }
  0x29   :  { %vm118_vm3 = vcmp.ge.f32.partialorder %v116_v16, 1.0  ;;  %vm119_vm4 = vcmp.ge.f32.partialorder %v117_v17, 1.0 }
  0x2a   :  { %v120_v18 = vsel %vm118_vm3, 0.0, %v116_v16  ;;  %v121_v19 = vsel %vm119_vm4, 0.0, %v117_v17  ;;  %v691_v20 = vsel %vm118_vm3, 1.0, %v936_v0  ;;  %v692_v21 = vsel %vm119_vm4, 1.0, %v936_v0 }
  0x2b   :  { %v127_v22 = vsub.f32 %v56_v3, %v120_v18  ;;  %v128_v23 = vsub.f32 %v57_v4, %v121_v19  ;;  %v126_v24 = vpack.c.bf16 %v692_v21, %v691_v20  ;;  %788 = vmatpush3.bf16.msra.mxu1 %v1032_v46 }
  0x2c   :  { %805 = vmatprep.subr.bf16.mxu1 %v936_v0 }
  0x2d   :  { %v129_v25 = vmul.f32 0.5, %v127_v22  ;;  %v130_v26 = vmul.f32 0.5, %v128_v23  ;;  %774 = vmatmul.mubr.msk.bf16.vlgmr.msra.gmra.mxu0 %vm167_vm0, %v126_v24 }
  0x2e   :  { %794 = vmatpush3.bf16.msra.mxu0 %v1005_v43 }
  0x2f   :  { %v131_v27 = vadd.f32 %v129_v25, %v120_v18  ;;  %v132_v28 = vadd.f32 %v130_v26, %v121_v19  ;;  %795 = vmatprep.subr.bf16.mxu0 %v936_v0 }
  0x31   :  { %vm133_vm5 = vcmp.ge.f32.partialorder %v131_v27, 1.0  ;;  %vm134_vm6 = vcmp.ge.f32.partialorder %v132_v28, 1.0 }
  0x32   :  { %v135_v29 = vsel %vm133_vm5, 0.0, %v131_v27  ;;  %v136_v30 = vsel %vm134_vm6, 0.0, %v132_v28  ;;  %v693_v31 = vsel %vm133_vm5, 1.0, %v936_v0  ;;  %v694_v32 = vsel %vm134_vm6, 1.0, %v936_v0  ;;  %796 = vmatpush3.bf16.msra.mxu0 %v1014_v44 }
  0x33   :  { %v141_v33 = vpack.c.bf16 %v694_v32, %v693_v31  ;;  %v142_v34 = vsub.f32 %v56_v3, %v135_v29  ;;  %v143_v35 = vsub.f32 %v57_v4, %v136_v30  ;;  %797 = vmatprep.subr.bf16.mxu0 %v936_v0 }
  0x35   :  { %777 = vmatprep.mubr.msk.bf16.mxu0 %vm167_vm0, %v141_v33  ;;  %v144_v36 = vmul.f32 0.5, %v142_v34  ;;  %v145_v37 = vmul.f32 0.5, %v143_v35 }
  0x36   :  { %798 = vmatpush3.bf16.msra.mxu0 %v1023_v45 }
  0x37   :  { %v146_v38 = vadd.f32 %v144_v36, %v135_v29  ;;  %v147_v39 = vadd.f32 %v145_v37, %v136_v30  ;;  %799 = vmatprep.subr.bf16.mxu0 %v936_v0 }
  0x39   :  { %vm148_vm7 = vcmp.ge.f32.partialorder %v146_v38, 1.0  ;;  %vm149_vm8 = vcmp.ge.f32.partialorder %v147_v39, 1.0  ;;  %v860_v39 = vld [vmem:[%s1134_s5 + $0x18] sm:$0xff]  }
  0x3a   :  { %v695_v40 = vsel %vm148_vm7, 1.0, %v936_v0  ;;  %v696_v41 = vsel %vm149_vm8, 1.0, %v936_v0  ;;  %800 = vmatpush3.bf16.msra.mxu0 %v1032_v46 }
  0x3b   :  { %v154_v42 = vpack.c.bf16 %v696_v41, %v695_v40  ;;  %817 = vmatprep.subr.bf16.mxu0 %v936_v0  ;;  %v861_v40 = vld [vmem:[%s1134_s5 + $0x10] sm:$0xff]   ;;  %v862_v41 = vld [vmem:[%s1134_s5 + $0x8] sm:$0xff]  }
  0x3d   :  { %778 = vmatmul.mubr.msk.bf16.gmra.mxu0 %vm167_vm0, %v154_v42  ;;  %v863_v42 = vld [vmem:[%s1134_s5] sm:$0xff]  }
  0x3e   :  { %801 = vmatprep.mubr.msk.bf16.mxu0 %vm937_vm9, %v936_v0 }
  0xed   :  { %v775_v47 = vpop.f32.mrf.mxu0 }
  0xee   :  { %v223_v54 = vadd.f32 %v775_v47, %v1045_v48 }
  0xef   :  { %v214_v49 = vpop.f32.mrf.mxu0 }
  0xf0   :  { %v215_v50 = vadd.f32 %v1045_v48, %v214_v49 }
  0xf1   :  { %v776_v51 = vpop.f32.mrf.mxu0 }
  0xf2   :  { %v245_v52 = vmul.f32 0.5, %v215_v50  ;;  %v226_v60 = vadd.f32 %v776_v51, %v1045_v48 }
  0xf3   :  { %v217_v53 = vpop.f32.mrf.mxu0 }
  0xf4   :  { %vm249_vm10 = vcmp.ge.f32.partialorder %v245_v52, 1.0  ;;  %v218_v55 = vadd.f32 %v1045_v48, %v217_v53 }
  0xf5   :  { %v251_v56 = vsel %vm249_vm10, 0.0, %v245_v52  ;;  %v703_v61 = vsel %vm249_vm10, 1.0, %v936_v0 }
  0xf6   :  { %v340_v57 = vsub.f32 %v223_v54, %v251_v56  ;;  %v246_v58 = vmul.f32 0.5, %v218_v55 }
  0xf8   :  { %v342_v59 = vmul.f32 0.5, %v340_v57  ;;  %vm250_vm11 = vcmp.ge.f32.partialorder %v246_v58, 1.0 }
  0xf9   :  { %v252_v62 = vsel %vm250_vm11, 0.0, %v246_v58  ;;  %v704_v63 = vsel %vm250_vm11, 1.0, %v936_v0  ;;  %vm659_vm11 = vcmask 130048  }
  0xfa   :  { %v344_v1 = vadd.f32 %v342_v59, %v251_v56  ;;  %v257_v2 = vpack.c.bf16 %v704_v63, %v703_v61  ;;  %v341_v3 = vsub.f32 %v226_v60, %v252_v62 }
  0xfc   :  { %v343_v4 = vmul.f32 0.5, %v341_v3  ;;  %790 = vmatmul.mubr.msk.bf16.vlgmr.msra.gmra.mxu1 %vm282_vm12, %v257_v2  ;;  %vm346_vm13 = vcmp.ge.f32.partialorder %v344_v1, 1.0 }
  0xfd   :  { %v779_v5 = vpop.f32.mrf.mxu0  ;;  %806 = vmatpush3.bf16.msra.mxu1 %v1005_v43  ;;  %813 = vmatprep.mubr.msk.bf16.mxu1 %vm937_vm9, %v936_v0  ;;  %v348_v9 = vsel %vm346_vm13, 0.0, %v344_v1  ;;  %v712_v10 = vsel %vm346_vm13, 1.0, %v936_v0 }
  0xfe   :  { %v345_v6 = vadd.f32 %v343_v4, %v252_v62  ;;  %807 = vmatprep.subr.bf16.mxu1 %v936_v0  ;;  %v239_v21 = vadd.f32 %v779_v5, %v1045_v48 }
  0xff   :  { %v230_v7 = vpop.f32.mrf.mxu0 }
 0x100   :  { %v231_v8 = vadd.f32 %v1045_v48, %v230_v7  ;;  %vm347_vm14 = vcmp.ge.f32.partialorder %v345_v6, 1.0 }
 0x101   :  { %v780_v11 = vpop.f32.mrf.mxu0  ;;  %v713_v12 = vsel %vm347_vm14, 1.0, %v936_v0  ;;  %808 = vmatpush3.bf16.msra.mxu1 %v1014_v44  ;;  %v349_v18 = vsel %vm347_vm14, 0.0, %v345_v6 }
 0x102   :  { %v414_v13 = vsub.f32 %v231_v8, %v348_v9  ;;  %v354_v14 = vpack.c.bf16 %v713_v12, %v712_v10  ;;  %809 = vmatprep.subr.bf16.mxu1 %v936_v0  ;;  %v242_v27 = vadd.f32 %v780_v11, %v1045_v48 }
 0x103   :  { %v233_v15 = vpop.f32.mrf.mxu0 }
 0x104   :  { %v416_v16 = vmul.f32 0.5, %v414_v13  ;;  %v234_v17 = vadd.f32 %v1045_v48, %v233_v15  ;;  %802 = vmatmul.mubr.msk.bf16.vlgmr.msra.gmra.mxu0 %vm282_vm12, %v354_v14 }
 0x105   :  { %810 = vmatpush3.bf16.msra.mxu1 %v1023_v45  ;;  %818 = vmatpush3.bf16.msra.mxu0 %v1005_v43  ;;  %v687_v43 = vld [vmem:[%s1133_s4] ss:$0 sm:$0xff] }
 0x106   :  { %v418_v19 = vadd.f32 %v416_v16, %v348_v9  ;;  %v415_v20 = vsub.f32 %v234_v17, %v349_v18  ;;  %811 = vmatprep.subr.bf16.mxu1 %v936_v0  ;;  %819 = vmatprep.subr.bf16.mxu0 %v936_v0 }
 0x107   :  { %825 = vmatprep.mubr.msk.bf16.mxu0 %vm937_vm9, %v936_v0 }
 0x108   :  { %vm420_vm15 = vcmp.ge.f32.partialorder %v418_v19, 1.0  ;;  %v417_v22 = vmul.f32 0.5, %v415_v20 }
 0x109   :  { %v422_v23 = vsel %vm420_vm15, 0.0, %v418_v19  ;;  %812 = vmatpush3.bf16.msra.mxu1 %v1032_v46  ;;  %820 = vmatpush3.bf16.msra.mxu0 %v1014_v44  ;;  %v717_v28 = vsel %vm420_vm15, 1.0, %v936_v0 }
 0x10a   :  { %v488_v24 = vsub.f32 %v239_v21, %v422_v23  ;;  %v419_v25 = vadd.f32 %v417_v22, %v349_v18  ;;  %821 = vmatprep.subr.bf16.mxu0 %v936_v0  ;;  %829 = vmatprep.subr.bf16.mxu1 %v860_v39 }
 0x10c   :  { %v490_v26 = vmul.f32 0.5, %v488_v24  ;;  %vm421_vm0 = vcmp.ge.f32.partialorder %v419_v25, 1.0 }
 0x10d   :  { %v423_v29 = vsel %vm421_vm0, 0.0, %v419_v25  ;;  %v718_v30 = vsel %vm421_vm0, 1.0, %v936_v0  ;;  %822 = vmatpush3.bf16.msra.mxu0 %v1023_v45 }
 0x10e   :  { %v492_v31 = vadd.f32 %v490_v26, %v422_v23  ;;  %v428_v32 = vpack.c.bf16 %v718_v30, %v717_v28  ;;  %v489_v33 = vsub.f32 %v242_v27, %v423_v29  ;;  %823 = vmatprep.subr.bf16.mxu0 %v936_v0 }
 0x110   :  { %v491_v34 = vmul.f32 0.5, %v489_v33  ;;  %814 = vmatmul.mubr.msk.bf16.vlgmr.msra.gmra.mxu1 %vm282_vm12, %v428_v32  ;;  %vm494_vm1 = vcmp.ge.f32.partialorder %v492_v31, 1.0 }
 0x111   :  { %824 = vmatpush3.bf16.msra.mxu0 %v1032_v46  ;;  %v722_v36 = vsel %vm494_vm1, 1.0, %v936_v0  ;;  %830 = vmatpush3.bf16.msra.mxu1 %v860_v39 }
 0x112   :  { %v493_v35 = vadd.f32 %v491_v34, %v423_v29  ;;  %831 = vmatprep.subr.bf16.mxu1 %v861_v40 }
 0x114   :  { %vm495_vm2 = vcmp.ge.f32.partialorder %v493_v35, 1.0 }
 0x115   :  { %v723_v37 = vsel %vm495_vm2, 1.0, %v936_v0  ;;  %832 = vmatpush3.bf16.msra.mxu1 %v861_v40 }
 0x116   :  { %v500_v38 = vpack.c.bf16 %v723_v37, %v722_v36  ;;  %833 = vmatprep.subr.bf16.mxu1 %v862_v41 }
 0x118   :  { %826 = vmatmul.mubr.msk.bf16.vlgmr.msra.gmra.mxu0 %vm282_vm12, %v500_v38 }
 0x119   :  { %834 = vmatpush3.bf16.msra.mxu1 %v862_v41 }
 0x11a   :  { %835 = vmatprep.subr.bf16.mxu1 %v863_v42 }
 0x11d   :  { %836 = vmatpush3.bf16.msra.mxu1 %v863_v42 }
 0x1bc   :  { %v320_v44 = vpop.f32.mrf.mxu1 }
 0x1bd   :  { %v321_v45 = vadd.f32 %v687_v43, %v320_v44 }
 0x1be   :  { %v791_v46 = vpop.f32.mrf.mxu1 }
 0x1bf   :  { %v327_v47 = vmul.f32 0.5, %v321_v45 }
 0x1c0   :  { %v323_v48 = vpop.f32.mrf.mxu1 }
 0x1c1   :  { %v324_v49 = vadd.f32 %v687_v43, %v323_v48  ;;  %vm331_vm3 = vcmp.ge.f32.partialorder %v327_v47, 1.0 }
 0x1c2   :  { %v792_v50 = vpop.f32.mrf.mxu1  ;;  %v333_v54 = vsel %vm331_vm3, 0.0, %v327_v47  ;;  %v710_v55 = vsel %vm331_vm3, 1.0, %v936_v0 }
 0x1c3   :  { %v328_v51 = vmul.f32 0.5, %v324_v49 }
 0x1c4   :  { %v392_v52 = vpop.f32.mrf.mxu0 }
 0x1c5   :  { %vm332_vm4 = vcmp.ge.f32.partialorder %v328_v51, 1.0  ;;  %v393_v53 = vadd.f32 %v687_v43, %v392_v52 }
 0x1c6   :  { %v711_v56 = vsel %vm332_vm4, 1.0, %v936_v0  ;;  %v803_v57 = vpop.f32.mrf.mxu0  ;;  %v334_v63 = vsel %vm332_vm4, 0.0, %v328_v51 }
 0x1c7   :  { %v339_v58 = vpack.c.bf16 %v711_v56, %v710_v55  ;;  %v399_v59 = vsub.f32 %v393_v53, %v333_v54 }
 0x1c8   :  { %v395_v60 = vpop.f32.mrf.mxu0 }
 0x1c9   :  { %v401_v61 = vmul.f32 0.5, %v399_v59  ;;  %v396_v62 = vadd.f32 %v687_v43, %v395_v60  ;;  %837 = vmatprep.mubr.msk.bf16.mxu1 %vm282_vm12, %v339_v58 }
 0x1ca   :  { %v804_v1 = vpop.f32.mrf.mxu0 }
 0x1cb   :  { %v403_v2 = vadd.f32 %v401_v61, %v333_v54  ;;  %v400_v3 = vsub.f32 %v396_v62, %v334_v63 }
 0x1cd   :  { %v402_v4 = vmul.f32 0.5, %v400_v3  ;;  %vm405_vm5 = vcmp.ge.f32.partialorder %v403_v2, 1.0 }
 0x1ce   :  { %v407_v8 = vsel %vm405_vm5, 0.0, %v403_v2  ;;  %v715_v9 = vsel %vm405_vm5, 1.0, %v936_v0 }
 0x1cf   :  { %v404_v5 = vadd.f32 %v402_v4, %v334_v63 }
 0x1d0   :  { %v466_v6 = vpop.f32.mrf.mxu1 }
 0x1d1   :  { %v467_v7 = vadd.f32 %v687_v43, %v466_v6  ;;  %vm406_vm6 = vcmp.ge.f32.partialorder %v404_v5, 1.0 }
 0x1d2   :  { %v815_v10 = vpop.f32.mrf.mxu1  ;;  %v716_v11 = vsel %vm406_vm6, 1.0, %v936_v0  ;;  %v408_v17 = vsel %vm406_vm6, 0.0, %v404_v5 }
 0x1d3   :  { %v473_v12 = vsub.f32 %v467_v7, %v407_v8  ;;  %v413_v13 = vpack.c.bf16 %v716_v11, %v715_v9 }
 0x1d4   :  { %v469_v14 = vpop.f32.mrf.mxu1 }
 0x1d5   :  { %v475_v15 = vmul.f32 0.5, %v473_v12  ;;  %v470_v16 = vadd.f32 %v687_v43, %v469_v14  ;;  %838 = vmatmul.mubr.msk.bf16.vlgmr.msra.gmra.mxu1 %vm282_vm12, %v413_v13 }
 0x1d6   :  { %v816_v18 = vpop.f32.mrf.mxu1 }
 0x1d7   :  { %v477_v19 = vadd.f32 %v475_v15, %v407_v8  ;;  %v474_v20 = vsub.f32 %v470_v16, %v408_v17 }
 0x1d8   :  { %v538_v21 = vpop.f32.mrf.mxu0 }
 0x1d9   :  { %v476_v22 = vmul.f32 0.5, %v474_v20  ;;  %vm479_vm7 = vcmp.ge.f32.partialorder %v477_v19, 1.0  ;;  %v539_v23 = vadd.f32 %v687_v43, %v538_v21 }
 0x1da   :  { %v481_v24 = vsel %vm479_vm7, 0.0, %v477_v19  ;;  %v827_v25 = vpop.f32.mrf.mxu0  ;;  %v720_v31 = vsel %vm479_vm7, 1.0, %v936_v0 }
 0x1db   :  { %v478_v26 = vadd.f32 %v476_v22, %v408_v17  ;;  %v545_v27 = vsub.f32 %v539_v23, %v481_v24 }
 0x1dc   :  { %v541_v28 = vpop.f32.mrf.mxu0 }
 0x1dd   :  { %v547_v29 = vmul.f32 0.5, %v545_v27  ;;  %vm480_vm8 = vcmp.ge.f32.partialorder %v478_v26, 1.0  ;;  %v542_v30 = vadd.f32 %v687_v43, %v541_v28  ;;  %v688_v43 = vld [vmem:[%s1135_s6] ss:$0 sm:$0xff]  ;;  %s938_s6 = smov [#allocation7]  }
 0x1de   :  { %v482_v32 = vsel %vm480_vm8, 0.0, %v478_v26  ;;  %v721_v33 = vsel %vm480_vm8, 1.0, %v936_v0  ;;  %v828_v34 = vpop.f32.mrf.mxu0  ;;  %s673_s10 = sshll.u32 %s938_s6, 4  ;;  %s674_s10 = int_to_ptr.vmem [resolvable:$true] %s673_s10 }
 0x1df   :  { %v549_v35 = vadd.f32 %v547_v29, %v481_v24  ;;  %v487_v36 = vpack.c.bf16 %v721_v33, %v720_v31  ;;  %v546_v37 = vsub.f32 %v542_v30, %v482_v32  ;;  %s904_s11 = scalar_lea.vmem %s674_s10, 1024  ;;  %p909_p11 = scmp.lt.s32.totalorder %s674_s10, %s674_s10 }
 0x1e0   :  { %p905_p10 = scmp.ne.s32.totalorder %s674_s10, %s904_s11  ;;  %p910_p12 = scmp.lt.s32.totalorder %s904_s11, %s904_s11 }
 0x1e1   :  { %v548_v38 = vmul.f32 0.5, %v546_v37  ;;  %841 = vmatprep.mubr.msk.bf16.mxu1 %vm282_vm12, %v487_v36  ;;  %vm551_vm9 = vcmp.ge.f32.partialorder %v549_v35, 1.0 }
 0x1e2   :  { %v725_v40 = vsel %vm551_vm9, 1.0, %v936_v0  ;;  %p911_p13 = por %p910_p12, %p909_p11 }
 0x1e3   :  { %v550_v39 = vadd.f32 %v548_v38, %v482_v32 }
 0x1e4   :  { %p912_p0 = pnand %p911_p13, %p905_p10 }
 0x1e5   :  { %vm552_vm10 = vcmp.ge.f32.partialorder %v550_v39, 1.0 }
 0x1e6   :  { %v726_v41 = vsel %vm552_vm10, 1.0, %v936_v0 }
 0x1e7   :  { %v557_v42 = vpack.c.bf16 %v726_v41, %v725_v40 }
 0x1e9   :  { %842 = vmatmul.mubr.msk.bf16.gmra.mxu1 %vm282_vm12, %v557_v42 }
 0x295   :  { %v839_v44 = vpop.f32.mrf.mxu1 }
 0x296   :  { %v637_v45 = vadd.f32 %v839_v44, %v688_v43 }
 0x297   :  { %v628_v46 = vpop.f32.mrf.mxu1 }
 0x298   :  { %662 = vst.msk [vmem:[#allocation7 + $0x10] sm:$0xff] %vm659_vm11, %v637_v45  ;;  %v629_v47 = vadd.f32 %v688_v43, %v628_v46 }
 0x299   :  { %v840_v48 = vpop.f32.mrf.mxu1 }
 0x29a   :  { %660 = vst.msk [vmem:[#allocation7] sm:$0xff] %vm659_vm11, %v629_v47  ;;  %v640_v49 = vadd.f32 %v840_v48, %v688_v43 }
 0x29b   :  { %v631_v50 = vpop.f32.mrf.mxu1 }
 0x29c   :  { %663 = vst.msk [vmem:[#allocation7 + $0x18] sm:$0xff] %vm659_vm11, %v640_v49  ;;  %v632_v0 = vadd.f32 %v688_v43, %v631_v50 }
 0x29e   :  { %661 = vst.msk [vmem:[#allocation7 + $0x8] sm:$0xff] %vm659_vm11, %v632_v0 }
 0x2a9   :  { %v843_v51 = vpop.f32.mrf.mxu1 }
 0x2aa   :  { %v653_v52 = vadd.f32 %v843_v51, %v688_v43 }
 0x2ab   :  { %v644_v53 = vpop.f32.mrf.mxu1 }
 0x2ac   :  { %666 = vst.msk [vmem:[#allocation7 + $0x30] sm:$0xff] %vm659_vm11, %v653_v52  ;;  %v645_v54 = vadd.f32 %v688_v43, %v644_v53 }
 0x2ad   :  { %v844_v55 = vpop.f32.mrf.mxu1 }
 0x2ae   :  { %664 = vst.msk [vmem:[#allocation7 + $0x20] sm:$0xff] %vm659_vm11, %v645_v54  ;;  %v656_v56 = vadd.f32 %v844_v55, %v688_v43 }
 0x2af   :  { %v647_v57 = vpop.f32.mrf.mxu1 }
 0x2b0   :  { %667 = vst.msk [vmem:[#allocation7 + $0x38] sm:$0xff] %vm659_vm11, %v656_v56  ;;  %v648_v58 = vadd.f32 %v688_v43, %v647_v57 }
 0x2b2   :  { %665 = vst.msk [vmem:[#allocation7 + $0x28] sm:$0xff] %vm659_vm11, %v648_v58 }
 0x2b3   :  { %915 = shalt.err (!%p912_p0)
}
 0x2b4   :  { %679 = dma.vmem_to_hbm [thread:$0]  %s674_s10, 1024, %s1136_s7, [#allocation4], %s931_s27, %s931_s27, %s932_s28  }
 0x2b5   :  { %928 = dma.done.wait [#allocation4], 1024  }
 0x2b6   :  { %929 = vsyncadd [#allocation4], 4294966272 }
 0x2b7   :  { %683 = vsyncpa [#allocation3], 1 }
 0x2b8   :  { %684 = vsyncpa [#allocation6], 1 }
 0x2b9   :  { %685 = vsyncpa [#allocation4], 1 }

</bundles_post_ra>
